<compile_context>
chip_gen: v6e
topology: v6e:2x2x1
jax: 0.10.0
libtpu: 0.0.40
codegen_flags: <defaults>
</compile_context>

<pallas_src>
import math

import jax
import jax.numpy as jnp
from jax.experimental import pallas as pl
from jax.experimental.pallas import tpu as pltpu

_DESIRED_ROWS_PER_STEP = 8192   # original (ungrouped) rows handled per grid step
_MIN_ROWS_FOR_SPLIT = 256       # below this, a single grid step is cheapest


def _mlp_kernel(x_ref, w1_ref, b1_ref, w2_ref, b2_ref, w3_ref, b3_ref, o_ref):
    # fc1 + relu (bias is (1, F) -> plain vreg broadcast over rows)
    h = jnp.dot(x_ref[...], w1_ref[...], preferred_element_type=jnp.float32)
    h = jnp.maximum(h + b1_ref[...], 0.0)
    # fc2 + relu
    h = jnp.dot(h, w2_ref[...], preferred_element_type=jnp.float32)
    h = jnp.maximum(h + b2_ref[...], 0.0)
    # fc3
    o = jnp.dot(h, w3_ref[...], preferred_element_type=jnp.float32)
    o_ref[...] = (o + b3_ref[...]).astype(o_ref.dtype)


def _round_up(v, mult):
    return ((v + mult - 1) // mult) * mult


def _choose_group(m):
    """Largest group size R in {16,8,4,2,1} dividing the row count, so the
    wrapper reshape is a free view (no pad / copy of x, no output slice)."""
    for r in (16, 8, 4, 2):
        if m % r == 0:
            return r
    return 1


def _choose_tile(g, r):
    """Group-row tile: big enough to amortize the per-step pipeline overhead,
    but >= 2 grid steps when there is enough work so v7x's second TensorCore
    is not left idle (irrelevant on single-TC v5e / v6e)."""
    desired_g = max(_DESIRED_ROWS_PER_STEP // r, 8)
    if g <= desired_g:
        tg = g  # single block == full array dim (always a legal block dim)
        if g * r >= _MIN_ROWS_FOR_SPLIT and g >= 16:
            tg = _round_up(pl.cdiv(g, 2), 8)
    else:
        tg = _round_up(desired_g, 8)
    return tg


@jax.jit
def non_periodic_forward(x, w1, b1, w2, b2, w3, b3):
    """x: (..., input_len) float32. Returns (..., out_len)."""
    input_len = x.shape[-1]
    hidden = w1.shape[1]
    out_len = w3.shape[1]

    lead_shape = x.shape[:-1]
    m = math.prod(lead_shape) if lead_shape else 1

    r = _choose_group(m)          # rows packed per group-row (lane density)
    g = m // r                    # number of group-rows
    tg = _choose_tile(g, r)
    grid = (pl.cdiv(g, tg),)

    # Free row-major reshape: R consecutive rows -> one lane-dense group row.
    xg = x.reshape(g, r * input_len)

    # Block-diagonal weights kron(I_R, W): groups stay independent, so
    # x_grp @ kron(I_R, W) == per-row x @ W.  Built once per call (tiny;
    # worst case ~2 MB total for R=16).
    eye = jnp.eye(r, dtype=w1.dtype)
    w1g = jnp.kron(eye, w1)
    w2g = jnp.kron(eye, w2)
    w3g = jnp.kron(eye, w3)
    b1g = jnp.tile(b1, r).reshape(1, r * hidden)
    b2g = jnp.tile(b2, r).reshape(1, r * hidden)
    b3g = jnp.tile(b3, r).reshape(1, r * out_len)

    out = pl.pallas_call(
        _mlp_kernel,
        out_shape=jax.ShapeDtypeStruct((g, r * out_len), x.dtype),
        grid_spec=pltpu.PrefetchScalarGridSpec(
            num_scalar_prefetch=0,
            grid=grid,
            in_specs=[
                pl.BlockSpec((tg, r * input_len), lambda i: (i, 0)),       # x
                # Grid-invariant weights/biases: constant block index ->
                # fetched once into VMEM, not re-DMA'd on every grid step.
                pl.BlockSpec((r * input_len, r * hidden), lambda i: (0, 0)),  # W1
                pl.BlockSpec((1, r * hidden), lambda i: (0, 0)),              # b1
                pl.BlockSpec((r * hidden, r * hidden), lambda i: (0, 0)),     # W2
                pl.BlockSpec((1, r * hidden), lambda i: (0, 0)),              # b2
                pl.BlockSpec((r * hidden, r * out_len), lambda i: (0, 0)),    # W3
                pl.BlockSpec((1, r * out_len), lambda i: (0, 0)),             # b3
            ],
            out_specs=pl.BlockSpec((tg, r * out_len), lambda i: (i, 0)),
        ),
        compiler_params=pltpu.CompilerParams(
            dimension_semantics=("parallel",)),
    )(xg, w1g, b1g, w2g, b2g, w3g, b3g)

    # Free row-major reshape back to (..., out_len).
    return out.reshape(*lead_shape, out_len)


def _init_linear(key, in_features, out_features):
    """Deterministic init mirroring nn.Linear's kaiming-uniform bounds.
    Weight stored transposed: (in_features, out_features)."""
    kw, kb = jax.random.split(key)
    bound = 1.0 / math.sqrt(in_features)
    w = jax.random.uniform(kw, (in_features, out_features),
                           minval=-bound, maxval=bound, dtype=jnp.float32)
    b = jax.random.uniform(kb, (out_features,),
                           minval=-bound, maxval=bound, dtype=jnp.float32)
    return w, b


def _reference(x, w1, b1, w2, b2, w3, b3):
    h = jnp.maximum(x @ w1 + b1, 0.0)
    h = jnp.maximum(h @ w2 + b2, 0.0)
    return h @ w3 + b3


if __name__ == "__main__":
    # args: input_len=16, embed_size(hidden)=32, out_len=8
    input_len, hidden, out_len = 16, 32, 8

    key = jax.random.PRNGKey(0)
    kx1, kx2, kx3, k1, k2, k3 = jax.random.split(key, 6)

    w1, b1 = _init_linear(k1, input_len, hidden)
    w2, b2 = _init_linear(k2, hidden, hidden)
    w3, b3 = _init_linear(k3, hidden, out_len)

    # Case 1: tiny batch (m=8 rows) -> group R=8, single grid step.
    x_small = jax.random.normal(kx1, (2, 4, input_len), dtype=jnp.float32)
    pred_small = non_periodic_forward(x_small, w1, b1, w2, b2, w3, b3)
    jax.block_until_ready(pred_small)
    ref_small = _reference(x_small, w1, b1, w2, b2, w3, b3)
    assert pred_small.shape == (2, 4, out_len)
    assert jnp.allclose(pred_small, ref_small, atol=1e-4, rtol=1e-4)

    # Case 2: m=256 rows -> fully lane-dense R=16 path, 2 "parallel" grid
    # steps (exercises the v7x megacore split).
    x_mid = jax.random.normal(kx3, (4, 64, input_len), dtype=jnp.float32)
    pred_mid = non_periodic_forward(x_mid, w1, b1, w2, b2, w3, b3)
    jax.block_until_ready(pred_mid)
    ref_mid = _reference(x_mid, w1, b1, w2, b2, w3, b3)
    assert pred_mid.shape == (4, 64, out_len)
    assert jnp.allclose(pred_mid, ref_mid, atol=1e-4, rtol=1e-4)

    # Case 3: m=520 rows (multiple of 8, not 16) -> R=8 path with a ragged
    # last block (padded read / masked writeback), 2 grid steps.
    x_big = jax.random.normal(kx2, (8, 65, input_len), dtype=jnp.float32)
    pred_big = non_periodic_forward(x_big, w1, b1, w2, b2, w3, b3)
    jax.block_until_ready(pred_big)
    ref_big = _reference(x_big, w1, b1, w2, b2, w3, b3)
    assert pred_big.shape == (8, 65, out_len)
    assert jnp.allclose(pred_big, ref_big, atol=1e-4, rtol=1e-4)

    print("KERNEL_OK")
</pallas_src>

<mosaic_0001>
module attributes {stable_mosaic.version = 11 : i64} {
  func.func @_mlp_kernel(%arg0: i32, %arg1: memref<1x128xf32, #tpu.memory_space<vmem>>, %arg2: memref<128x256xf32, #tpu.memory_space<vmem>>, %arg3: memref<1x256xf32, #tpu.memory_space<vmem>>, %arg4: memref<256x256xf32, #tpu.memory_space<vmem>>, %arg5: memref<1x256xf32, #tpu.memory_space<vmem>>, %arg6: memref<256x64xf32, #tpu.memory_space<vmem>>, %arg7: memref<1x64xf32, #tpu.memory_space<vmem>>, %arg8: memref<1x64xf32, #tpu.memory_space<vmem>>) attributes {dimension_semantics = [#tpu.dimension_semantics<parallel>], iteration_bounds = array<i64: 1>, scalar_prefetch = 0 : i64, scratch_operands = 0 : i64, tpu.core_type = #tpu.core_type<tc>, window_params = [{transform_indices = @transform_0, window_bounds = array<i64: 1, 128>}, {pipeline_mode = #tpu.pipeline_mode<synchronous>, transform_indices = @transform_1, window_bounds = array<i64: 128, 256>}, {pipeline_mode = #tpu.pipeline_mode<synchronous>, transform_indices = @transform_2, window_bounds = array<i64: 1, 256>}, {pipeline_mode = #tpu.pipeline_mode<synchronous>, transform_indices = @transform_3, window_bounds = array<i64: 256, 256>}, {pipeline_mode = #tpu.pipeline_mode<synchronous>, transform_indices = @transform_4, window_bounds = array<i64: 1, 256>}, {pipeline_mode = #tpu.pipeline_mode<synchronous>, transform_indices = @transform_5, window_bounds = array<i64: 256, 64>}, {pipeline_mode = #tpu.pipeline_mode<synchronous>, transform_indices = @transform_6, window_bounds = array<i64: 1, 64>}, {transform_indices = @transform_7, window_bounds = array<i64: 1, 64>}]} {
    %c0 = arith.constant 0 : index
    %c0_0 = arith.constant 0 : index
    %0 = vector.load %arg1[%c0, %c0_0] : memref<1x128xf32, #tpu.memory_space<vmem>>, vector<1x128xf32>
    %c0_1 = arith.constant 0 : index
    %c0_2 = arith.constant 0 : index
    %1 = vector.load %arg2[%c0_1, %c0_2] : memref<128x256xf32, #tpu.memory_space<vmem>>, vector<128x256xf32>
    %cst = arith.constant dense<0.000000e+00> : vector<1x256xf32>
    %2 = tpu.matmul %0, %1, %cst {dimension_numbers = #tpu.dot_dimension_numbers<[1], [0], [0], [1], [0, 0, 1, 1], [], []>} : vector<1x128xf32>, vector<128x256xf32>, vector<1x256xf32> -> vector<1x256xf32>
    %c0_3 = arith.constant 0 : index
    %c0_4 = arith.constant 0 : index
    %3 = vector.load %arg3[%c0_3, %c0_4] : memref<1x256xf32, #tpu.memory_space<vmem>>, vector<1x256xf32>
    %4 = arith.addf %2, %3 : vector<1x256xf32>
    %cst_5 = arith.constant 0.000000e+00 : f32
    %5 = vector.broadcast %cst_5 : f32 to vector<1x256xf32>
    %6 = arith.maximumf %4, %5 : vector<1x256xf32>
    %c0_6 = arith.constant 0 : index
    %c0_7 = arith.constant 0 : index
    %7 = vector.load %arg4[%c0_6, %c0_7] : memref<256x256xf32, #tpu.memory_space<vmem>>, vector<256x256xf32>
    %cst_8 = arith.constant dense<0.000000e+00> : vector<1x256xf32>
    %8 = tpu.matmul %6, %7, %cst_8 {dimension_numbers = #tpu.dot_dimension_numbers<[1], [0], [0], [1], [0, 0, 1, 1], [], []>} : vector<1x256xf32>, vector<256x256xf32>, vector<1x256xf32> -> vector<1x256xf32>
    %c0_9 = arith.constant 0 : index
    %c0_10 = arith.constant 0 : index
    %9 = vector.load %arg5[%c0_9, %c0_10] : memref<1x256xf32, #tpu.memory_space<vmem>>, vector<1x256xf32>
    %10 = arith.addf %8, %9 : vector<1x256xf32>
    %cst_11 = arith.constant 0.000000e+00 : f32
    %11 = vector.broadcast %cst_11 : f32 to vector<1x256xf32>
    %12 = arith.maximumf %10, %11 : vector<1x256xf32>
    %c0_12 = arith.constant 0 : index
    %c0_13 = arith.constant 0 : index
    %13 = vector.load %arg6[%c0_12, %c0_13] : memref<256x64xf32, #tpu.memory_space<vmem>>, vector<256x64xf32>
    %cst_14 = arith.constant dense<0.000000e+00> : vector<1x64xf32>
    %14 = tpu.matmul %12, %13, %cst_14 {dimension_numbers = #tpu.dot_dimension_numbers<[1], [0], [0], [1], [0, 0, 1, 1], [], []>} : vector<1x256xf32>, vector<256x64xf32>, vector<1x64xf32> -> vector<1x64xf32>
    %c0_15 = arith.constant 0 : index
    %c0_16 = arith.constant 0 : index
    %15 = vector.load %arg7[%c0_15, %c0_16] : memref<1x64xf32, #tpu.memory_space<vmem>>, vector<1x64xf32>
    %16 = arith.addf %14, %15 : vector<1x64xf32>
    %c0_17 = arith.constant 0 : index
    %c0_18 = arith.constant 0 : index
    %17 = vector.load %arg8[%c0_17, %c0_18] : memref<1x64xf32, #tpu.memory_space<vmem>>, vector<1x64xf32>
    tpu.vector_store %arg8[%c0_17, %c0_18], %16 {strides = array<i32>} : memref<1x64xf32, #tpu.memory_space<vmem>>, vector<1x64xf32>,
    return
  }
  func.func @transform_0(%arg0: i32) -> (i32, i32) {
    %c0_i32 = arith.constant 0 : i32
    %c0_i32_0 = arith.constant 0 : i32
    return %arg0, %c0_i32 : i32, i32
  }
  func.func @transform_1(%arg0: i32) -> (i32, i32) {
    %c0_i32 = arith.constant 0 : i32
    %c0_i32_0 = arith.constant 0 : i32
    %c0_i32_1 = arith.constant 0 : i32
    return %c0_i32, %c0_i32_0 : i32, i32
  }
  func.func @transform_2(%arg0: i32) -> (i32, i32) {
    %c0_i32 = arith.constant 0 : i32
    %c0_i32_0 = arith.constant 0 : i32
    %c0_i32_1 = arith.constant 0 : i32
    return %c0_i32, %c0_i32_0 : i32, i32
  }
  func.func @transform_3(%arg0: i32) -> (i32, i32) {
    %c0_i32 = arith.constant 0 : i32
    %c0_i32_0 = arith.constant 0 : i32
    %c0_i32_1 = arith.constant 0 : i32
    return %c0_i32, %c0_i32_0 : i32, i32
  }
  func.func @transform_4(%arg0: i32) -> (i32, i32) {
    %c0_i32 = arith.constant 0 : i32
    %c0_i32_0 = arith.constant 0 : i32
    %c0_i32_1 = arith.constant 0 : i32
    return %c0_i32, %c0_i32_0 : i32, i32
  }
  func.func @transform_5(%arg0: i32) -> (i32, i32) {
    %c0_i32 = arith.constant 0 : i32
    %c0_i32_0 = arith.constant 0 : i32
    %c0_i32_1 = arith.constant 0 : i32
    return %c0_i32, %c0_i32_0 : i32, i32
  }
  func.func @transform_6(%arg0: i32) -> (i32, i32) {
    %c0_i32 = arith.constant 0 : i32
    %c0_i32_0 = arith.constant 0 : i32
    %c0_i32_1 = arith.constant 0 : i32
    return %c0_i32, %c0_i32_0 : i32, i32
  }
  func.func @transform_7(%arg0: i32) -> (i32, i32) {
    %c0_i32 = arith.constant 0 : i32
    %c0_i32_0 = arith.constant 0 : i32
    return %arg0, %c0_i32 : i32, i32
  }
}

</mosaic_0001>

<bundles_post_ra>
// kernel: tile.18
= control target key start
LH: loop header
LB: loop body
LE: loop exit
PB: predicated region body
PF: predicated region fallthrough
CT: control target
= control target key end

     0   :  { %s22_s0 = inlined_call_operand.vmem [shape: f32[32], index: 0, kind: input, shape index: {}]   ;;  %s23_s1 = inlined_call_operand.vmem [shape: f32[8,32], index: 1, kind: output, shape index: {}]  }
   0x1   :  { %v4_v0 = vld [vmem:[%s22_s0] ss:$0 sm:$0xff] }
   0x2   :  { %5 = vst [vmem:[%s23_s1] sm:$0xff] %v4_v0 }

// kernel: tile.19
= control target key start
LH: loop header
LB: loop body
LE: loop exit
PB: predicated region body
PF: predicated region fallthrough
CT: control target
= control target key end

     0   :  { %s7_s6 = smov 3  ;;  %s14_s9 = smov 3  ;;  %vm4_vm0 = vcmask 261120   ;;  %vm11_vm1 = vcmask 1048320   ;;  %vm18_vm2 = vcmask 785920   ;;  %vm25_vm3 = vcmask 523520   ;;  %s79_s0 = inlined_call_operand.vmem [shape: f32[8,32], index: 0, kind: input, shape index: {}]   ;;  %s80_s1 = inlined_call_operand.vmem [shape: f32[1,256], index: 1, kind: output, shape index: {}]  }
   0x1   :  { %v41_v0 = vld [vmem:[%s79_s0 + $0x3] ss:$4 sm:%s7_s6]   ;;  %s48_s10 = smov 96   ;;  %s21_s11 = smov 3  ;;  %v42_v1 = vld [vmem:[%s79_s0 + $0x2] ss:$4 sm:%s14_s9]  }
   0x2   :  { %9 = vrot.lane.b32.xlu0 %v41_v0, %s48_s10  ;;  %v43_v2 = vld [vmem:[%s79_s0 + $0x1] ss:$4 sm:%s21_s11]   ;;  %s2_s16 = smov 3  ;;  %s49_s17 = smov 32  }
   0x3   :  { %23 = vrot.lane.b32.xlu1 %v43_v2, %s49_s17  ;;  %v3_v3 = vld [vmem:[%s79_s0] ss:$4 sm:%s2_s16]   ;;  %s50_s0 = smov 64  }
   0x4   :  { %5 = vst.msk [vmem:[#allocation0] ss:$8 sm:$0x3] %vm4_vm0, %v3_v3  }
   0x6   :  { %16 = vrot.lane.b32.xlu0 %v42_v1, %s50_s0 }
  0x74   :  { %v10_v4 = vpop.permute.xlu0 %9  }
  0x75   :  { %12 = vst.msk [vmem:[#allocation0] ss:$8 sm:$0x3] %vm11_vm1, %v10_v4   ;;  %v24_v5 = vpop.permute.xlu1 %23  }
  0x78   :  { %v17_v6 = vpop.permute.xlu0 %16  }
  0x79   :  { %19 = vst.msk [vmem:[#allocation0] ss:$8 sm:$0x3] %vm18_vm2, %v17_v6  }
  0x7a   :  { %26 = vst.msk [vmem:[#allocation0] ss:$8 sm:$0x3] %vm25_vm3, %v24_v5  }
  0x81   :  { %v31_v7 = vld [vmem:[#allocation0] sm:$0x1]  ;;  %v36_v8 = vld [vmem:[#allocation0 + $0x8] sm:$0x1] }
  0x82   :  { %34 = vst [vmem:[%s80_s1] sm:$0x1] %v31_v7  ;;  %44 = vst [vmem:[%s80_s1 + $0x1] sm:$0x1] %v36_v8 }

// kernel: tile.28
= control target key start
LH: loop header
LB: loop body
LE: loop exit
PB: predicated region body
PF: predicated region fallthrough
CT: control target
= control target key end

     0   :  { %s22_s0 = inlined_call_operand.vmem [shape: f32[8], index: 0, kind: input, shape index: {}]   ;;  %s23_s1 = inlined_call_operand.vmem [shape: f32[8,8], index: 1, kind: output, shape index: {}]  }
   0x1   :  { %v4_v0 = vld [vmem:[%s22_s0] ss:$0 sm:$0xff] }
   0x2   :  { %5 = vst [vmem:[%s23_s1] sm:$0xff] %v4_v0 }

// kernel: tile.29
= control target key start
LH: loop header
LB: loop body
LE: loop exit
PB: predicated region body
PF: predicated region fallthrough
CT: control target
= control target key end

     0   :  { %s69_s10 = smov 56   ;;  %s70_s11 = smov 40   ;;  %vm3_vm0 = vcmask 64512   ;;  %vm9_vm1 = vcmask 523712   ;;  %vm15_vm2 = vcmask 458112   ;;  %vm21_vm3 = vcmask 392512   ;;  %s113_s0 = inlined_call_operand.vmem [shape: f32[8,8], index: 0, kind: input, shape index: {}]   ;;  %s114_s1 = inlined_call_operand.vmem [shape: f32[1,64], index: 1, kind: output, shape index: {}]  }
   0x1   :  { %v55_v0 = vld [vmem:[%s113_s0 + $0x7] sm:$0x1]   ;;  %v57_v1 = vld [vmem:[%s113_s0 + $0x5] sm:$0x1]   ;;  %v56_v2 = vld [vmem:[%s113_s0 + $0x6] sm:$0x1]  }
   0x2   :  { %7 = vrot.lane.b32.xlu0 %v55_v0, %s69_s10  ;;  %19 = vrot.lane.b32.xlu1 %v57_v1, %s70_s11  ;;  %v58_v3 = vld [vmem:[%s113_s0 + $0x4] sm:$0x1]   ;;  %v2_v4 = vld [vmem:[%s113_s0] sm:$0x1]   ;;  %s71_s18 = smov 48   ;;  %s72_s19 = smov 32  }
   0x3   :  { %4 = vst.msk [vmem:[#allocation0] sm:$0x1] %vm3_vm0, %v2_v4   ;;  %v59_v5 = vld [vmem:[%s113_s0 + $0x3] sm:$0x1]   ;;  %v60_v6 = vld [vmem:[%s113_s0 + $0x2] sm:$0x1]  }
   0x4   :  { %s73_s24 = smov 24   ;;  %s74_s25 = smov 16   ;;  %v61_v7 = vld [vmem:[%s113_s0 + $0x1] sm:$0x1]   ;;  %vm27_vm4 = vcmask 326912   ;;  %vm33_vm5 = vcmask 261312  }
   0x5   :  { %s75_s0 = smov 8   ;;  %vm39_vm6 = vcmask 195712   ;;  %vm45_vm7 = vcmask 130112  }
   0x6   :  { %13 = vrot.lane.b32.xlu0 %v56_v2, %s71_s18  ;;  %25 = vrot.lane.b32.xlu1 %v58_v3, %s72_s19 }
   0xa   :  { %31 = vrot.lane.b32.xlu0 %v59_v5, %s73_s24  ;;  %37 = vrot.lane.b32.xlu1 %v60_v6, %s74_s25 }
   0xe   :  { %43 = vrot.lane.b32.xlu0 %v61_v7, %s75_s0 }
  0x74   :  { %v8_v8 = vpop.permute.xlu0 %7   ;;  %v20_v9 = vpop.permute.xlu1 %19  }
  0x75   :  { %10 = vst.msk [vmem:[#allocation0] sm:$0x1] %vm9_vm1, %v8_v8  }
  0x78   :  { %v14_v10 = vpop.permute.xlu0 %13   ;;  %v26_v11 = vpop.permute.xlu1 %25  }
  0x79   :  { %16 = vst.msk [vmem:[#allocation0] sm:$0x1] %vm15_vm2, %v14_v10  }
  0x7a   :  { %22 = vst.msk [vmem:[#allocation0] sm:$0x1] %vm21_vm3, %v20_v9  }
  0x7b   :  { %28 = vst.msk [vmem:[#allocation0] sm:$0x1] %vm27_vm4, %v26_v11  }
  0x7c   :  { %v32_v12 = vpop.permute.xlu0 %31   ;;  %v38_v13 = vpop.permute.xlu1 %37  }
  0x7d   :  { %34 = vst.msk [vmem:[#allocation0] sm:$0x1] %vm33_vm5, %v32_v12  }
  0x7e   :  { %40 = vst.msk [vmem:[#allocation0] sm:$0x1] %vm39_vm6, %v38_v13  }
  0x80   :  { %v44_v14 = vpop.permute.xlu0 %43  }
  0x81   :  { %46 = vst.msk [vmem:[#allocation0] sm:$0x1] %vm45_vm7, %v44_v14  }
  0x88   :  { %v51_v15 = vld [vmem:[#allocation0] sm:$0x1] }
  0x89   :  { %54 = vst [vmem:[%s114_s1] sm:$0x1] %v51_v15 }

// kernel: non_periodic_forward.1
= control target key start
LH: loop header
LB: loop body
LE: loop exit
PB: predicated region body
PF: predicated region fallthrough
CT: control target
= control target key end

     0   :  { %v438_v3 = vmov 0.0   ;;  %vm396_vm0 = vcmask 516096   ;;  %s878_s1 = inlined_call_operand.vmem [shape: f32[128,256], index: 1, kind: input, shape index: {}]   ;;  %s879_s3 = inlined_call_operand.vmem [shape: f32[256,256], index: 3, kind: input, shape index: {}]   ;;  %s880_s0 = inlined_call_operand.vmem [shape: f32[1,128], index: 0, kind: input, shape index: {}]   ;;  %s881_s5 = inlined_call_operand.vmem [shape: f32[256,64], index: 5, kind: input, shape index: {}]   ;;  %s882_s2 = inlined_call_operand.vmem [shape: f32[1,256], index: 2, kind: input, shape index: {}]   ;;  %s883_s4 = inlined_call_operand.vmem [shape: f32[1,256], index: 4, kind: input, shape index: {}]   ;;  %s884_s6 = inlined_call_operand.vmem [shape: f32[1,64], index: 6, kind: input, shape index: {}]   ;;  %s885_s7 = inlined_call_operand.vmem [shape: f32[1,64], index: 7, kind: output, shape index: {}]  }
   0x1   :  { %v58_v0 = vld [vmem:[%s878_s1 + $0xf8] sm:$0xff]  ;;  %v57_v1 = vld [vmem:[%s878_s1 + $0xf0] sm:$0xff]  ;;  %v56_v2 = vld [vmem:[%s878_s1 + $0xe8] sm:$0xff]  ;;  %135 = vmatprep.mubr.f32.mxu0 %v438_v3 }
   0x2   :  { %71 = vmatprep.subr.mxu0 %v58_v0  ;;  %v55_v4 = vld [vmem:[%s878_s1 + $0xe0] sm:$0xff]  ;;  %v54_v5 = vld [vmem:[%s878_s1 + $0xd8] sm:$0xff]  ;;  %v53_v6 = vld [vmem:[%s878_s1 + $0xd0] sm:$0xff] }
   0x3   :  { %72 = vmatpush1.msra.mxu0 %v57_v1  ;;  %v52_v7 = vld [vmem:[%s878_s1 + $0xc8] sm:$0xff]  ;;  %v51_v8 = vld [vmem:[%s878_s1 + $0xc0] sm:$0xff]  ;;  %v50_v9 = vld [vmem:[%s878_s1 + $0xb8] sm:$0xff] }
   0x4   :  { %73 = vmatprep.subr.mxu0 %v56_v2  ;;  %v49_v10 = vld [vmem:[%s878_s1 + $0xb0] sm:$0xff]  ;;  %v48_v11 = vld [vmem:[%s878_s1 + $0xa8] sm:$0xff]  ;;  %v47_v12 = vld [vmem:[%s878_s1 + $0xa0] sm:$0xff] }
   0x5   :  { %74 = vmatpush1.msra.mxu0 %v55_v4  ;;  %v46_v13 = vld [vmem:[%s878_s1 + $0x98] sm:$0xff]  ;;  %v45_v14 = vld [vmem:[%s878_s1 + $0x90] sm:$0xff]  ;;  %v173_v17 = vld [vmem:[%s879_s3 + $0xe8] sm:$0xff] }
   0x6   :  { %75 = vmatprep.subr.mxu0 %v54_v5  ;;  %v175_v15 = vld [vmem:[%s879_s3 + $0xf8] sm:$0xff]  ;;  %v174_v16 = vld [vmem:[%s879_s3 + $0xf0] sm:$0xff]  ;;  %v44_v18 = vld [vmem:[%s878_s1 + $0x88] sm:$0xff] }
   0x7   :  { %76 = vmatpush1.msra.mxu0 %v53_v6  ;;  %220 = vmatprep.subr.mxu1 %v175_v15  ;;  %v172_v19 = vld [vmem:[%s879_s3 + $0xe0] sm:$0xff]  ;;  %v171_v21 = vld [vmem:[%s879_s3 + $0xd8] sm:$0xff]  ;;  %v170_v23 = vld [vmem:[%s879_s3 + $0xd0] sm:$0xff] }
   0x8   :  { %77 = vmatprep.subr.mxu0 %v52_v7  ;;  %v43_v20 = vld [vmem:[%s878_s1 + $0x80] sm:$0xff]  ;;  %221 = vmatpush1.msra.mxu1 %v174_v16  ;;  %v42_v22 = vld [vmem:[%s878_s1 + $0x78] sm:$0xff]  ;;  %v41_v24 = vld [vmem:[%s878_s1 + $0x70] sm:$0xff] }
   0x9   :  { %78 = vmatpush1.msra.mxu0 %v51_v8  ;;  %222 = vmatprep.subr.mxu1 %v173_v17  ;;  %v169_v25 = vld [vmem:[%s879_s3 + $0xc8] sm:$0xff]  ;;  %v168_v27 = vld [vmem:[%s879_s3 + $0xc0] sm:$0xff]  ;;  %v167_v29 = vld [vmem:[%s879_s3 + $0xb8] sm:$0xff] }
   0xa   :  { %79 = vmatprep.subr.mxu0 %v50_v9  ;;  %223 = vmatpush1.msra.mxu1 %v172_v19  ;;  %v40_v26 = vld [vmem:[%s878_s1 + $0x68] sm:$0xff]  ;;  %v39_v28 = vld [vmem:[%s878_s1 + $0x60] sm:$0xff]  ;;  %v38_v30 = vld [vmem:[%s878_s1 + $0x58] sm:$0xff] }
   0xb   :  { %80 = vmatpush1.msra.mxu0 %v49_v10  ;;  %224 = vmatprep.subr.mxu1 %v171_v21  ;;  %v166_v31 = vld [vmem:[%s879_s3 + $0xb0] sm:$0xff]  ;;  %v165_v33 = vld [vmem:[%s879_s3 + $0xa8] sm:$0xff]  ;;  %v164_v35 = vld [vmem:[%s879_s3 + $0xa0] sm:$0xff] }
   0xc   :  { %81 = vmatprep.subr.mxu0 %v48_v11  ;;  %225 = vmatpush1.msra.mxu1 %v170_v23  ;;  %v37_v32 = vld [vmem:[%s878_s1 + $0x50] sm:$0xff]  ;;  %v36_v34 = vld [vmem:[%s878_s1 + $0x48] sm:$0xff]  ;;  %v35_v36 = vld [vmem:[%s878_s1 + $0x40] sm:$0xff] }
   0xd   :  { %82 = vmatpush1.msra.mxu0 %v47_v12  ;;  %226 = vmatprep.subr.mxu1 %v169_v25  ;;  %v163_v37 = vld [vmem:[%s879_s3 + $0x98] sm:$0xff]  ;;  %v162_v39 = vld [vmem:[%s879_s3 + $0x90] sm:$0xff]  ;;  %v161_v41 = vld [vmem:[%s879_s3 + $0x88] sm:$0xff] }
   0xe   :  { %83 = vmatprep.subr.mxu0 %v46_v13  ;;  %227 = vmatpush1.msra.mxu1 %v168_v27  ;;  %v34_v38 = vld [vmem:[%s878_s1 + $0x38] sm:$0xff]  ;;  %v33_v40 = vld [vmem:[%s878_s1 + $0x30] sm:$0xff]  ;;  %v32_v42 = vld [vmem:[%s878_s1 + $0x28] sm:$0xff] }
   0xf   :  { %84 = vmatpush1.msra.mxu0 %v45_v14  ;;  %228 = vmatprep.subr.mxu1 %v167_v29  ;;  %v160_v43 = vld [vmem:[%s879_s3 + $0x80] sm:$0xff]  ;;  %v159_v45 = vld [vmem:[%s879_s3 + $0x78] sm:$0xff]  ;;  %v158_v47 = vld [vmem:[%s879_s3 + $0x70] sm:$0xff] }
  0x10   :  { %85 = vmatprep.subr.mxu0 %v44_v18  ;;  %229 = vmatpush1.msra.mxu1 %v166_v31  ;;  %v31_v44 = vld [vmem:[%s878_s1 + $0x20] sm:$0xff]  ;;  %v30_v46 = vld [vmem:[%s878_s1 + $0x18] sm:$0xff]  ;;  %v29_v48 = vld [vmem:[%s878_s1 + $0x10] sm:$0xff] }
  0x11   :  { %86 = vmatpush1.msra.mxu0 %v43_v20  ;;  %230 = vmatprep.subr.mxu1 %v165_v33  ;;  %v157_v49 = vld [vmem:[%s879_s3 + $0x68] sm:$0xff]  ;;  %v156_v51 = vld [vmem:[%s879_s3 + $0x60] sm:$0xff]  ;;  %v155_v53 = vld [vmem:[%s879_s3 + $0x58] sm:$0xff] }
  0x12   :  { %87 = vmatprep.subr.mxu0 %v42_v22  ;;  %231 = vmatpush1.msra.mxu1 %v164_v35  ;;  %v28_v50 = vld [vmem:[%s878_s1 + $0x8] sm:$0xff]  ;;  %v27_v52 = vld [vmem:[%s878_s1] sm:$0xff]  ;;  %v154_v55 = vld [vmem:[%s879_s3 + $0x50] sm:$0xff] }
  0x13   :  { %88 = vmatpush1.msra.mxu0 %v41_v24  ;;  %232 = vmatprep.subr.mxu1 %v163_v37  ;;  %v26_v54 = vld [vmem:[%s880_s0] sm:$0x1]  ;;  %v153_v56 = vld [vmem:[%s879_s3 + $0x48] sm:$0xff]  ;;  %v151_v58 = vld [vmem:[%s879_s3 + $0x38] sm:$0xff] }
  0x14   :  { %89 = vmatprep.subr.mxu0 %v40_v26  ;;  %233 = vmatpush1.msra.mxu1 %v162_v39  ;;  %v152_v57 = vld [vmem:[%s879_s3 + $0x40] sm:$0xff]  ;;  %v150_v59 = vld [vmem:[%s879_s3 + $0x30] sm:$0xff]  ;;  %v149_v60 = vld [vmem:[%s879_s3 + $0x28] sm:$0xff] }
  0x15   :  { %90 = vmatpush1.msra.mxu0 %v39_v28  ;;  %234 = vmatprep.subr.mxu1 %v161_v41  ;;  %v148_v61 = vld [vmem:[%s879_s3 + $0x20] sm:$0xff]  ;;  %v147_v62 = vld [vmem:[%s879_s3 + $0x18] sm:$0xff]  ;;  %v146_v63 = vld [vmem:[%s879_s3 + $0x10] sm:$0xff] }
  0x16   :  { %91 = vmatprep.subr.mxu0 %v38_v30  ;;  %235 = vmatpush1.msra.mxu1 %v160_v43  ;;  %v145_v0 = vld [vmem:[%s879_s3 + $0x8] sm:$0xff]  ;;  %v144_v1 = vld [vmem:[%s879_s3] sm:$0xff]  ;;  %v207_v2 = vld [vmem:[%s879_s3 + $0x1f8] sm:$0xff] }
  0x17   :  { %92 = vmatpush1.msra.mxu0 %v37_v32  ;;  %236 = vmatprep.subr.mxu1 %v159_v45  ;;  %v206_v3 = vld [vmem:[%s879_s3 + $0x1f0] sm:$0xff]  ;;  %v205_v4 = vld [vmem:[%s879_s3 + $0x1e8] sm:$0xff]  ;;  %v204_v5 = vld [vmem:[%s879_s3 + $0x1e0] sm:$0xff] }
  0x18   :  { %93 = vmatprep.subr.mxu0 %v36_v34  ;;  %237 = vmatpush1.msra.mxu1 %v158_v47  ;;  %v203_v6 = vld [vmem:[%s879_s3 + $0x1d8] sm:$0xff]  ;;  %v202_v7 = vld [vmem:[%s879_s3 + $0x1d0] sm:$0xff]  ;;  %v201_v8 = vld [vmem:[%s879_s3 + $0x1c8] sm:$0xff] }
  0x19   :  { %94 = vmatpush1.msra.mxu0 %v35_v36  ;;  %238 = vmatprep.subr.mxu1 %v157_v49  ;;  %v200_v9 = vld [vmem:[%s879_s3 + $0x1c0] sm:$0xff]  ;;  %v199_v10 = vld [vmem:[%s879_s3 + $0x1b8] sm:$0xff]  ;;  %v198_v11 = vld [vmem:[%s879_s3 + $0x1b0] sm:$0xff] }
  0x1a   :  { %95 = vmatprep.subr.mxu0 %v34_v38  ;;  %239 = vmatpush1.msra.mxu1 %v156_v51  ;;  %v197_v12 = vld [vmem:[%s879_s3 + $0x1a8] sm:$0xff]  ;;  %v196_v13 = vld [vmem:[%s879_s3 + $0x1a0] sm:$0xff]  ;;  %v195_v14 = vld [vmem:[%s879_s3 + $0x198] sm:$0xff] }
  0x1b   :  { %96 = vmatpush1.msra.mxu0 %v33_v40  ;;  %240 = vmatprep.subr.mxu1 %v155_v53  ;;  %v194_v15 = vld [vmem:[%s879_s3 + $0x190] sm:$0xff]  ;;  %v193_v16 = vld [vmem:[%s879_s3 + $0x188] sm:$0xff]  ;;  %v192_v17 = vld [vmem:[%s879_s3 + $0x180] sm:$0xff] }
  0x1c   :  { %97 = vmatprep.subr.mxu0 %v32_v42  ;;  %241 = vmatpush1.msra.mxu1 %v154_v55  ;;  %v191_v18 = vld [vmem:[%s879_s3 + $0x178] sm:$0xff]  ;;  %v190_v19 = vld [vmem:[%s879_s3 + $0x170] sm:$0xff]  ;;  %v189_v20 = vld [vmem:[%s879_s3 + $0x168] sm:$0xff] }
  0x1d   :  { %98 = vmatpush1.msra.mxu0 %v31_v44  ;;  %242 = vmatprep.subr.mxu1 %v153_v56  ;;  %v188_v21 = vld [vmem:[%s879_s3 + $0x160] sm:$0xff]  ;;  %v187_v22 = vld [vmem:[%s879_s3 + $0x158] sm:$0xff]  ;;  %v186_v23 = vld [vmem:[%s879_s3 + $0x150] sm:$0xff] }
  0x1e   :  { %99 = vmatprep.subr.mxu0 %v30_v46  ;;  %243 = vmatpush1.msra.mxu1 %v152_v57  ;;  %v185_v24 = vld [vmem:[%s879_s3 + $0x148] sm:$0xff]  ;;  %v184_v25 = vld [vmem:[%s879_s3 + $0x140] sm:$0xff]  ;;  %v183_v26 = vld [vmem:[%s879_s3 + $0x138] sm:$0xff] }
  0x1f   :  { %100 = vmatpush1.msra.mxu0 %v29_v48  ;;  %244 = vmatprep.subr.mxu1 %v151_v58  ;;  %v182_v27 = vld [vmem:[%s879_s3 + $0x130] sm:$0xff]  ;;  %v181_v28 = vld [vmem:[%s879_s3 + $0x128] sm:$0xff]  ;;  %v180_v29 = vld [vmem:[%s879_s3 + $0x120] sm:$0xff]  ;;  %v61_v58 = vlaneseq }
  0x20   :  { %101 = vmatprep.subr.mxu0 %v28_v50  ;;  %245 = vmatpush1.msra.mxu1 %v150_v59  ;;  %v179_v30 = vld [vmem:[%s879_s3 + $0x118] sm:$0xff]  ;;  %v178_v31 = vld [vmem:[%s879_s3 + $0x110] sm:$0xff]  ;;  %v177_v32 = vld [vmem:[%s879_s3 + $0x108] sm:$0xff] }
  0x21   :  { %102 = vmatpush1.msra.mxu0 %v27_v52  ;;  %246 = vmatprep.subr.mxu1 %v149_v60  ;;  %v176_v33 = vld [vmem:[%s879_s3 + $0x100] sm:$0xff]  ;;  %v324_v34 = vld [vmem:[%s881_s5 + $0xf8] sm:$0xff]  ;;  %v323_v36 = vld [vmem:[%s881_s5 + $0xf0] sm:$0xff]  ;;  %v62_v59 = vshrl.u32 %v61_v58, 7 }
  0x22   :  { %136 = vmatmul.mubr.f32.vlgmr.msra.gmra.mxu0 %v26_v54  ;;  %247 = vmatpush1.msra.mxu1 %v148_v61  ;;  %v308_v35 = vld [vmem:[%s881_s5 + $0x78] sm:$0xff]  ;;  %v307_v37 = vld [vmem:[%s881_s5 + $0x70] sm:$0xff]  ;;  %v322_v38 = vld [vmem:[%s881_s5 + $0xe8] sm:$0xff] }
  0x23   :  { %248 = vmatprep.subr.mxu1 %v147_v62  ;;  %402 = vmatprep.subr.mxu0 %v324_v34  ;;  %v306_v39 = vld [vmem:[%s881_s5 + $0x68] sm:$0xff]  ;;  %v321_v40 = vld [vmem:[%s881_s5 + $0xe0] sm:$0xff]  ;;  %v320_v42 = vld [vmem:[%s881_s5 + $0xd8] sm:$0xff]  ;;  %v63_v60 = vsub.s32 0, %v62_v59  ;;  %v67_v62 = vsub.s32 1, %v62_v59 }
  0x24   :  { %249 = vmatpush1.msra.mxu1 %v146_v63  ;;  %403 = vmatpush3.msra.mxu0 %v308_v35  ;;  %v305_v41 = vld [vmem:[%s881_s5 + $0x60] sm:$0xff]  ;;  %v304_v43 = vld [vmem:[%s881_s5 + $0x58] sm:$0xff]  ;;  %v319_v44 = vld [vmem:[%s881_s5 + $0xd0] sm:$0xff] }
  0x25   :  { %250 = vmatprep.subr.mxu1 %v145_v0  ;;  %404 = vmatprep.subr.mxu0 %v323_v36  ;;  %v303_v45 = vld [vmem:[%s881_s5 + $0x50] sm:$0xff]  ;;  %v318_v46 = vld [vmem:[%s881_s5 + $0xc8] sm:$0xff]  ;;  %v317_v48 = vld [vmem:[%s881_s5 + $0xc0] sm:$0xff] }
  0x26   :  { %251 = vmatpush1.msra.mxu1 %v144_v1  ;;  %405 = vmatpush3.msra.mxu0 %v307_v37  ;;  %v302_v47 = vld [vmem:[%s881_s5 + $0x48] sm:$0xff]  ;;  %v301_v49 = vld [vmem:[%s881_s5 + $0x40] sm:$0xff]  ;;  %v316_v50 = vld [vmem:[%s881_s5 + $0xb8] sm:$0xff] }
  0x27   :  { %252 = vmatprep.subr.mxu1 %v207_v2  ;;  %406 = vmatprep.subr.mxu0 %v322_v38  ;;  %v300_v51 = vld [vmem:[%s881_s5 + $0x38] sm:$0xff]  ;;  %v315_v52 = vld [vmem:[%s881_s5 + $0xb0] sm:$0xff]  ;;  %v314_v54 = vld [vmem:[%s881_s5 + $0xa8] sm:$0xff] }
  0x28   :  { %253 = vmatpush2.msra.mxu1 %v206_v3  ;;  %407 = vmatpush3.msra.mxu0 %v306_v39  ;;  %v299_v53 = vld [vmem:[%s881_s5 + $0x30] sm:$0xff]  ;;  %v298_v55 = vld [vmem:[%s881_s5 + $0x28] sm:$0xff]  ;;  %v313_v56 = vld [vmem:[%s881_s5 + $0xa0] sm:$0xff] }
  0x29   :  { %254 = vmatprep.subr.mxu1 %v205_v4  ;;  %408 = vmatprep.subr.mxu0 %v321_v40  ;;  %v297_v57 = vld [vmem:[%s881_s5 + $0x20] sm:$0xff] }
  0x2a   :  { %255 = vmatpush2.msra.mxu1 %v204_v5  ;;  %409 = vmatpush3.msra.mxu0 %v305_v41  ;;  %v59_v61 = vld [vmem:[%s882_s2] sm:$0x3] }
  0x2b   :  { %256 = vmatprep.subr.mxu1 %v203_v6  ;;  %410 = vmatprep.subr.mxu0 %v320_v42  ;;  %v64_v63 = vrot.slane %v59_v61, %v63_v60  ;;  %v68_v0 = vrot.slane %v59_v61, %v67_v62 }
  0x2c   :  { %257 = vmatpush2.msra.mxu1 %v202_v7  ;;  %411 = vmatpush3.msra.mxu0 %v304_v43  ;;  %v312_v7 = vld [vmem:[%s881_s5 + $0x98] sm:$0xff] }
  0x2d   :  { %258 = vmatprep.subr.mxu1 %v201_v8  ;;  %412 = vmatprep.subr.mxu0 %v319_v44  ;;  %v296_v8 = vld [vmem:[%s881_s5 + $0x18] sm:$0xff] }
  0x2e   :  { %259 = vmatpush2.msra.mxu1 %v200_v9  ;;  %413 = vmatpush3.msra.mxu0 %v303_v45  ;;  %v311_v9 = vld [vmem:[%s881_s5 + $0x90] sm:$0xff] }
  0x2f   :  { %260 = vmatprep.subr.mxu1 %v199_v10  ;;  %414 = vmatprep.subr.mxu0 %v318_v46  ;;  %v295_v10 = vld [vmem:[%s881_s5 + $0x10] sm:$0xff] }
  0x30   :  { %261 = vmatpush2.msra.mxu1 %v198_v11  ;;  %415 = vmatpush3.msra.mxu0 %v302_v47  ;;  %v310_v11 = vld [vmem:[%s881_s5 + $0x88] sm:$0xff] }
  0x31   :  { %262 = vmatprep.subr.mxu1 %v197_v12  ;;  %416 = vmatprep.subr.mxu0 %v317_v48  ;;  %v294_v12 = vld [vmem:[%s881_s5 + $0x8] sm:$0xff] }
  0x32   :  { %263 = vmatpush2.msra.mxu1 %v196_v13  ;;  %417 = vmatpush3.msra.mxu0 %v301_v49  ;;  %v309_v13 = vld [vmem:[%s881_s5 + $0x80] sm:$0xff] }
  0x33   :  { %264 = vmatprep.subr.mxu1 %v195_v14  ;;  %418 = vmatprep.subr.mxu0 %v316_v50  ;;  %v293_v14 = vld [vmem:[%s881_s5] sm:$0xff] }
  0x34   :  { %265 = vmatpush2.msra.mxu1 %v194_v15  ;;  %419 = vmatpush3.msra.mxu0 %v300_v51  ;;  %v208_v15 = vld [vmem:[%s883_s4] sm:$0x3] }
  0x35   :  { %266 = vmatprep.subr.mxu1 %v193_v16  ;;  %420 = vmatprep.subr.mxu0 %v315_v52  ;;  %v213_v16 = vrot.slane %v208_v15, %v63_v60 }
  0x36   :  { %267 = vmatpush2.msra.mxu1 %v192_v17  ;;  %421 = vmatpush3.msra.mxu0 %v299_v53  ;;  %v217_v17 = vrot.slane %v208_v15, %v67_v62 }
  0x37   :  { %268 = vmatprep.subr.mxu1 %v191_v18  ;;  %422 = vmatprep.subr.mxu0 %v314_v54 }
  0x38   :  { %269 = vmatpush2.msra.mxu1 %v190_v19  ;;  %423 = vmatpush3.msra.mxu0 %v298_v55 }
  0x39   :  { %270 = vmatprep.subr.mxu1 %v189_v20  ;;  %424 = vmatprep.subr.mxu0 %v313_v56 }
  0x3a   :  { %271 = vmatpush2.msra.mxu1 %v188_v21  ;;  %425 = vmatpush3.msra.mxu0 %v297_v57 }
  0x3b   :  { %272 = vmatprep.subr.mxu1 %v187_v22  ;;  %426 = vmatprep.subr.mxu0 %v312_v7 }
  0x3c   :  { %273 = vmatpush2.msra.mxu1 %v186_v23  ;;  %427 = vmatpush3.msra.mxu0 %v296_v8 }
  0x3d   :  { %274 = vmatprep.subr.mxu1 %v185_v24  ;;  %428 = vmatprep.subr.mxu0 %v311_v9 }
  0x3e   :  { %275 = vmatpush2.msra.mxu1 %v184_v25  ;;  %429 = vmatpush3.msra.mxu0 %v295_v10  ;;  %v325_v25 = vld [vmem:[%s884_s6] sm:$0x1] }
  0x3f   :  { %276 = vmatprep.subr.mxu1 %v183_v26  ;;  %430 = vmatprep.subr.mxu0 %v310_v11 }
  0x40   :  { %277 = vmatpush2.msra.mxu1 %v182_v27  ;;  %431 = vmatpush3.msra.mxu0 %v294_v12 }
  0x41   :  { %278 = vmatprep.subr.mxu1 %v181_v28  ;;  %432 = vmatprep.subr.mxu0 %v309_v13 }
  0x42   :  { %279 = vmatpush2.msra.mxu1 %v180_v29  ;;  %433 = vmatpush3.msra.mxu0 %v293_v14 }
  0x43   :  { %280 = vmatprep.subr.mxu1 %v179_v30 }
  0x44   :  { %281 = vmatpush2.msra.mxu1 %v178_v31 }
  0x45   :  { %282 = vmatprep.subr.mxu1 %v177_v32 }
  0x46   :  { %283 = vmatpush2.msra.mxu1 %v176_v33 }
  0xe2   :  { %v137_v1 = vpop.f32.mrf.mxu0 }
  0xe3   :  { %v138_v2 = vadd.f32 %v137_v1, %v64_v63 }
  0xe4   :  { %v139_v3 = vpop.f32.mrf.mxu0 }
  0xe5   :  { %v140_v4 = vadd.f32 %v139_v3, %v68_v0  ;;  %v142_v6 = vmax.f32 %v138_v2, 0.0 }
  0xe7   :  { %v143_v5 = vmax.f32 %v140_v4, 0.0 }
  0xe9   :  { %284 = vmatprep.mubr.f32.mxu1 %v143_v5 }
  0xea   :  { %285 = vmatmul.mubr.f32.vlgmr.msra.gmra.mxu1 %v142_v6 }
 0x1aa   :  { %v286_v18 = vpop.f32.mrf.mxu1 }
 0x1ab   :  { %v287_v19 = vadd.f32 %v286_v18, %v213_v16 }
 0x1ac   :  { %v288_v20 = vpop.f32.mrf.mxu1 }
 0x1ad   :  { %v289_v21 = vadd.f32 %v288_v20, %v217_v17  ;;  %v291_v23 = vmax.f32 %v287_v19, 0.0 }
 0x1af   :  { %v292_v22 = vmax.f32 %v289_v21, 0.0 }
 0x1b1   :  { %390 = vmatprep.mubr.f32.mxu0 %v292_v22 }
 0x1b2   :  { %391 = vmatmul.mubr.f32.vlgmr.msra.gmra.mxu0 %v291_v23 }
 0x272   :  { %v434_v24 = vpop.f32.mrf.mxu0 }
 0x274   :  { %v435_v26 = vpop.f32.mrf.mxu0 }
 0x275   :  { %v436_v27 = vadd.f32 %v435_v26, %v434_v24 }
 0x277   :  { %v393_v28 = vadd.f32 %v436_v27, %v325_v25 }
 0x279   :  { %397 = vst.msk [vmem:[%s885_s7] sm:$0x1] %vm396_vm0, %v393_v28 }

</bundles_post_ra>
